<compile_context>
chip_gen: v7x
topology: tpu7x:2x2x1
jax: 0.10.0
libtpu: 0.0.40
codegen_flags: <defaults>
</compile_context>

<pallas_src>
import jax
import jax.numpy as jnp
from jax.experimental import pallas as pl
from jax.experimental.pallas import tpu as pltpu


def _critic_mlp_kernel(obs_ref, act_ref, pref_ref,
                       w1o_ref, w1a_ref, w1p_ref, b1_ref,
                       w2_ref, b2_ref, w3_ref, b3_ref,
                       o_ref):
    """Fused MLP: o = relu(relu([obs|act|pref]@W1 + b1)@W2 + b2)@W3 + b3.

    Concat fused via split W1.  Activations are cast to the weight dtype
    in-kernel (no-op for f32); all matmuls accumulate in f32."""
    cdt = w1o_ref.dtype

    # Layer 1: x @ W1 as a sum of three row-block matmuls.
    h = jnp.dot(obs_ref[...].astype(cdt), w1o_ref[...],
                preferred_element_type=jnp.float32)
    h = h + jnp.dot(act_ref[...].astype(cdt), w1a_ref[...],
                    preferred_element_type=jnp.float32)
    h = h + jnp.dot(pref_ref[...].astype(cdt), w1p_ref[...],
                    preferred_element_type=jnp.float32)
    h = jnp.maximum(h + b1_ref[...], 0.0)            # f32 bias + ReLU (VPU)

    # Layer 2.
    h = jnp.dot(h.astype(cdt), w2_ref[...], preferred_element_type=jnp.float32)
    h = jnp.maximum(h + b2_ref[...], 0.0)

    # Output layer (no final activation on the head).
    out = jnp.dot(h.astype(cdt), w3_ref[...], preferred_element_type=jnp.float32)
    o_ref[...] = (out + b3_ref[...]).astype(o_ref.dtype)


def _round_up(x, m):
    return ((x + m - 1) // m) * m


def critic_forward(obs, action, prefs, params, *, batch_tile=None,
                   compute_dtype=jnp.float32, target_grid_steps=4):
    """Pallas-backed forward pass of the Critic.

    obs:    (B, obs_dim)     float
    action: (B, action_dim)  float
    prefs:  (B, reward_dim)  float
    returns (B, reward_dim)  float32
    """
    B, obs_dim = obs.shape
    act_dim = action.shape[1]
    pref_dim = prefs.shape[1]

    w1, b1, w2, b2, w3, b3 = (params["w1"], params["b1"], params["w2"],
                              params["b2"], params["w3"], params["b3"])
    d_in = w1.shape[0]
    assert d_in == obs_dim + act_dim + pref_dim
    h1 = w1.shape[1]
    h2 = w2.shape[1]
    d_out = w3.shape[1]

    # Split W1 row-wise so the (obs, action, prefs) concat never materializes.
    w1o = w1[:obs_dim]
    w1a = w1[obs_dim:obs_dim + act_dim]
    w1p = w1[obs_dim + act_dim:]

    cdt = jnp.dtype(compute_dtype)
    # Only the tiny grid-invariant weights are host-cast.  Activations stream
    # in their producer dtype and are cast in-kernel (avoids a standalone XLA
    # cast pass over the dominant byte stream).
    w1o, w1a, w1p = w1o.astype(cdt), w1a.astype(cdt), w1p.astype(cdt)
    w2c, w3c = w2.astype(cdt), w3.astype(cdt)
    # Biases stay f32 (added to the f32 accumulator on the VPU).
    b1c, b2c, b3c = (b1.astype(jnp.float32), b2.astype(jnp.float32),
                     b3.astype(jnp.float32))

    # ---- Batch tiling -----------------------------------------------------
    # Sublane packing of the compute dtype: 8 rows (f32), 16 (bf16), 32 (i8).
    packing = 8 * max(1, 4 // cdt.itemsize)
    mxu_rows = 256
    if batch_tile is None:
        cap = 8192 if cdt.itemsize >= 4 else 16384
        # Aim for >= target_grid_steps grid steps (pipelining + both v7x TCs),
        # but never tiles so small that per-step overhead dominates huge B.
        tb = max(packing, _round_up(pl.cdiv(B, target_grid_steps), packing))
        if tb > mxu_rows:
            tb = _round_up(tb, mxu_rows)
        tb = min(tb, cap)
    else:
        tb = max(packing, _round_up(int(batch_tile), packing))

    grid = (pl.cdiv(B, tb),)      # ragged last block handled by Pallas; rows
                                  # are independent so garbage tail rows are
                                  # computed and their output writes dropped.

    # ---- Generation-aware VMEM limit --------------------------------------
    try:
        vmem_phys = int(pltpu.get_tpu_info().vmem_capacity_bytes)
    except Exception:
        vmem_phys = 64 * 2**20                       # conservative (v7x)
    vmem_cap = 40 * 2**20 if vmem_phys <= 64 * 2**20 else 64 * 2**20

    in_itemsize = jnp.dtype(obs.dtype).itemsize      # activations stay f32
    tile_bytes = tb * d_in * in_itemsize + tb * d_out * 4
    weight_bytes = ((d_in * h1 + h1 * h2 + h2 * d_out) * cdt.itemsize
                    + (h1 + h2 + d_out) * 4)
    interm_bytes = tb * (h1 + h2) * (4 + cdt.itemsize)
    needed = 2 * (2 * tile_bytes + 2 * weight_bytes + interm_bytes)  # 2x margin
    vmem_limit = int(min(vmem_cap, max(16 * 2**20, needed)))

    cost = pl.CostEstimate(
        flops=2 * B * (d_in * h1 + h1 * h2 + h2 * d_out),
        transcendentals=0,
        bytes_accessed=int(B * (d_in * in_itemsize + d_out * 4) + weight_bytes),
    )

    # Constant (grid-invariant) full blocks for weights/biases.
    full = lambda shape: pl.BlockSpec(shape, lambda i: (0,) * len(shape))

    out = pl.pallas_call(
        _critic_mlp_kernel,
        out_shape=jax.ShapeDtypeStruct((B, d_out), jnp.float32),
        grid_spec=pltpu.PrefetchScalarGridSpec(
            num_scalar_prefetch=0,
            grid=grid,
            in_specs=[
                pl.BlockSpec((tb, obs_dim), lambda i: (i, 0)),    # obs tile
                pl.BlockSpec((tb, act_dim), lambda i: (i, 0)),    # action tile
                pl.BlockSpec((tb, pref_dim), lambda i: (i, 0)),   # prefs tile
                full((obs_dim, h1)),                              # W1[obs rows]
                full((act_dim, h1)),                              # W1[act rows]
                full((pref_dim, h1)),                             # W1[pref rows]
                full((1, h1)),                                    # b1
                full((h1, h2)),                                   # W2
                full((1, h2)),                                    # b2
                full((h2, d_out)),                                # W3
                full((1, d_out)),                                 # b3
            ],
            out_specs=pl.BlockSpec((tb, d_out), lambda i: (i, 0)),
        ),
        compiler_params=pltpu.CompilerParams(
            dimension_semantics=("parallel",),
            vmem_limit_bytes=vmem_limit),
        cost_estimate=cost,
    )(obs, action, prefs, w1o, w1a, w1p, b1c, w2c, b2c, w3c, b3c)

    return out


def init_critic_params(key, obs_dim, action_dim, reward_dim, layer_dims):
    """Init matching the module: input_dim = obs_dim + action_dim + reward_dim
    (target_net_inputs = all), hidden layers from cfg.layer_dims, output dim =
    reward_dim; nn.Linear-style uniform init."""
    d_in = obs_dim + action_dim + reward_dim
    dims = [d_in] + list(layer_dims) + [reward_dim]
    names = ["1", "2", "3"]
    assert len(dims) - 1 == len(names)

    params = {}
    for n, (fan_in, fan_out) in zip(names, zip(dims[:-1], dims[1:])):
        key, kw, kb = jax.random.split(key, 3)
        bound = 1.0 / jnp.sqrt(float(fan_in))
        params[f"w{n}"] = jax.random.uniform(
            kw, (fan_in, fan_out), jnp.float32, -bound, bound)
        params[f"b{n}"] = jax.random.uniform(
            kb, (1, fan_out), jnp.float32, -bound, bound)
    return params


def _reference_forward(obs, action, prefs, params):
    x = jnp.concatenate((obs, action, prefs), axis=-1)
    h = jnp.maximum(x @ params["w1"] + params["b1"], 0.0)
    h = jnp.maximum(h @ params["w2"] + params["b2"], 0.0)
    return h @ params["w3"] + params["b3"]


if __name__ == "__main__":
    obs_dim = 16
    action_dim = 4
    reward_dim = 2          # d: reward-space dimensionality -> output dim
    layer_dims = (32, 32)   # cfg.layer_dims (hidden layers)

    key = jax.random.PRNGKey(0)
    key, k_par = jax.random.split(key)
    params = init_critic_params(k_par, obs_dim, action_dim, reward_dim,
                                layer_dims)

    # --- Case 1: small batch, f32 compute (exact path, single grid step) ---
    batch = 8
    key, k_obs, k_act, k_pref = jax.random.split(key, 4)
    obs = jax.random.normal(k_obs, (batch, obs_dim), jnp.float32)
    action = jax.random.normal(k_act, (batch, action_dim), jnp.float32)
    prefs = jax.nn.softmax(
        jax.random.normal(k_pref, (batch, reward_dim), jnp.float32), axis=-1)

    q = jax.block_until_ready(critic_forward(obs, action, prefs, params))
    q_ref = _reference_forward(obs, action, prefs, params)
    assert q.shape == (batch, reward_dim)
    assert jnp.allclose(q, q_ref, atol=1e-4, rtol=1e-4), "f32 small-batch mismatch"

    # --- Case 2: ragged batch, multi-step cdiv grid (no host pad), f32 -----
    batch2 = 300
    key, k_obs, k_act, k_pref = jax.random.split(key, 4)
    obs2 = jax.random.normal(k_obs, (batch2, obs_dim), jnp.float32)
    action2 = jax.random.normal(k_act, (batch2, action_dim), jnp.float32)
    prefs2 = jax.nn.softmax(
        jax.random.normal(k_pref, (batch2, reward_dim), jnp.float32), axis=-1)

    q2 = jax.block_until_ready(critic_forward(obs2, action2, prefs2, params))
    q2_ref = _reference_forward(obs2, action2, prefs2, params)
    assert q2.shape == (batch2, reward_dim)
    assert jnp.allclose(q2, q2_ref, atol=1e-4, rtol=1e-4), "f32 ragged-grid mismatch"

    # Explicit user tile (also ragged): 300 rows @ 128-row tiles -> 3 steps.
    q2b = jax.block_until_ready(
        critic_forward(obs2, action2, prefs2, params, batch_tile=128))
    assert jnp.allclose(q2b, q2_ref, atol=1e-4, rtol=1e-4), "f32 tiled mismatch"

    # --- Case 3: bf16 weights, in-kernel activation cast, f32 accumulation -
    q3 = jax.block_until_ready(
        critic_forward(obs2, action2, prefs2, params,
                       compute_dtype=jnp.bfloat16))
    assert q3.shape == (batch2, reward_dim)
    assert jnp.allclose(q3, q2_ref, atol=5e-2, rtol=5e-2), "bf16 path mismatch"

    print("KERNEL_OK")
</pallas_src>

<mosaic_0001>
module attributes {stable_mosaic.version = 11 : i64} {
  func.func @_critic_mlp_kernel(%arg0: i32, %arg1: memref<8x16xf32, #tpu.memory_space<vmem>>, %arg2: memref<8x4xf32, #tpu.memory_space<vmem>>, %arg3: memref<8x2xf32, #tpu.memory_space<vmem>>, %arg4: memref<16x32xf32, #tpu.memory_space<vmem>>, %arg5: memref<4x32xf32, #tpu.memory_space<vmem>>, %arg6: memref<2x32xf32, #tpu.memory_space<vmem>>, %arg7: memref<1x32xf32, #tpu.memory_space<vmem>>, %arg8: memref<32x32xf32, #tpu.memory_space<vmem>>, %arg9: memref<1x32xf32, #tpu.memory_space<vmem>>, %arg10: memref<32x2xf32, #tpu.memory_space<vmem>>, %arg11: memref<1x2xf32, #tpu.memory_space<vmem>>, %arg12: memref<8x2xf32, #tpu.memory_space<vmem>>) attributes {dimension_semantics = [#tpu.dimension_semantics<parallel>], iteration_bounds = array<i64: 1>, scalar_prefetch = 0 : i64, scratch_operands = 0 : i64, tpu.core_type = #tpu.core_type<tc>, window_params = [{transform_indices = @transform_0, window_bounds = array<i64: 8, 16>}, {transform_indices = @transform_1, window_bounds = array<i64: 8, 4>}, {transform_indices = @transform_2, window_bounds = array<i64: 8, 2>}, {pipeline_mode = #tpu.pipeline_mode<synchronous>, transform_indices = @transform_3, window_bounds = array<i64: 16, 32>}, {pipeline_mode = #tpu.pipeline_mode<synchronous>, transform_indices = @transform_4, window_bounds = array<i64: 4, 32>}, {pipeline_mode = #tpu.pipeline_mode<synchronous>, transform_indices = @transform_5, window_bounds = array<i64: 2, 32>}, {pipeline_mode = #tpu.pipeline_mode<synchronous>, transform_indices = @transform_6, window_bounds = array<i64: 1, 32>}, {pipeline_mode = #tpu.pipeline_mode<synchronous>, transform_indices = @transform_7, window_bounds = array<i64: 32, 32>}, {pipeline_mode = #tpu.pipeline_mode<synchronous>, transform_indices = @transform_8, window_bounds = array<i64: 1, 32>}, {pipeline_mode = #tpu.pipeline_mode<synchronous>, transform_indices = @transform_9, window_bounds = array<i64: 32, 2>}, {pipeline_mode = #tpu.pipeline_mode<synchronous>, transform_indices = @transform_10, window_bounds = array<i64: 1, 2>}, {transform_indices = @transform_11, window_bounds = array<i64: 8, 2>}]} {
    %c0 = arith.constant 0 : index
    %c0_0 = arith.constant 0 : index
    %0 = vector.load %arg1[%c0, %c0_0] : memref<8x16xf32, #tpu.memory_space<vmem>>, vector<8x16xf32>
    %c0_1 = arith.constant 0 : index
    %c0_2 = arith.constant 0 : index
    %1 = vector.load %arg4[%c0_1, %c0_2] : memref<16x32xf32, #tpu.memory_space<vmem>>, vector<16x32xf32>
    %cst = arith.constant dense<0.000000e+00> : vector<8x32xf32>
    %2 = tpu.matmul %0, %1, %cst {dimension_numbers = #tpu.dot_dimension_numbers<[1], [0], [0], [1], [0, 0, 1, 1], [], []>} : vector<8x16xf32>, vector<16x32xf32>, vector<8x32xf32> -> vector<8x32xf32>
    %c0_3 = arith.constant 0 : index
    %c0_4 = arith.constant 0 : index
    %3 = vector.load %arg2[%c0_3, %c0_4] : memref<8x4xf32, #tpu.memory_space<vmem>>, vector<8x4xf32>
    %c0_5 = arith.constant 0 : index
    %c0_6 = arith.constant 0 : index
    %4 = vector.load %arg5[%c0_5, %c0_6] : memref<4x32xf32, #tpu.memory_space<vmem>>, vector<4x32xf32>
    %cst_7 = arith.constant dense<0.000000e+00> : vector<8x32xf32>
    %5 = tpu.matmul %3, %4, %cst_7 {dimension_numbers = #tpu.dot_dimension_numbers<[1], [0], [0], [1], [0, 0, 1, 1], [], []>} : vector<8x4xf32>, vector<4x32xf32>, vector<8x32xf32> -> vector<8x32xf32>
    %6 = arith.addf %2, %5 : vector<8x32xf32>
    %c0_8 = arith.constant 0 : index
    %c0_9 = arith.constant 0 : index
    %7 = vector.load %arg3[%c0_8, %c0_9] : memref<8x2xf32, #tpu.memory_space<vmem>>, vector<8x2xf32>
    %c0_10 = arith.constant 0 : index
    %c0_11 = arith.constant 0 : index
    %8 = vector.load %arg6[%c0_10, %c0_11] : memref<2x32xf32, #tpu.memory_space<vmem>>, vector<2x32xf32>
    %cst_12 = arith.constant dense<0.000000e+00> : vector<8x32xf32>
    %9 = tpu.matmul %7, %8, %cst_12 {dimension_numbers = #tpu.dot_dimension_numbers<[1], [0], [0], [1], [0, 0, 1, 1], [], []>} : vector<8x2xf32>, vector<2x32xf32>, vector<8x32xf32> -> vector<8x32xf32>
    %10 = arith.addf %6, %9 : vector<8x32xf32>
    %c0_13 = arith.constant 0 : index
    %c0_14 = arith.constant 0 : index
    %11 = vector.load %arg7[%c0_13, %c0_14] : memref<1x32xf32, #tpu.memory_space<vmem>>, vector<1x32xf32>
    %12 = vector.broadcast %11 : vector<1x32xf32> to vector<8x32xf32>
    %13 = arith.addf %10, %12 : vector<8x32xf32>
    %cst_15 = arith.constant 0.000000e+00 : f32
    %14 = vector.broadcast %cst_15 : f32 to vector<8x32xf32>
    %15 = arith.maximumf %13, %14 : vector<8x32xf32>
    %c0_16 = arith.constant 0 : index
    %c0_17 = arith.constant 0 : index
    %16 = vector.load %arg8[%c0_16, %c0_17] : memref<32x32xf32, #tpu.memory_space<vmem>>, vector<32x32xf32>
    %cst_18 = arith.constant dense<0.000000e+00> : vector<8x32xf32>
    %17 = tpu.matmul %15, %16, %cst_18 {dimension_numbers = #tpu.dot_dimension_numbers<[1], [0], [0], [1], [0, 0, 1, 1], [], []>} : vector<8x32xf32>, vector<32x32xf32>, vector<8x32xf32> -> vector<8x32xf32>
    %c0_19 = arith.constant 0 : index
    %c0_20 = arith.constant 0 : index
    %18 = vector.load %arg9[%c0_19, %c0_20] : memref<1x32xf32, #tpu.memory_space<vmem>>, vector<1x32xf32>
    %19 = vector.broadcast %18 : vector<1x32xf32> to vector<8x32xf32>
    %20 = arith.addf %17, %19 : vector<8x32xf32>
    %cst_21 = arith.constant 0.000000e+00 : f32
    %21 = vector.broadcast %cst_21 : f32 to vector<8x32xf32>
    %22 = arith.maximumf %20, %21 : vector<8x32xf32>
    %c0_22 = arith.constant 0 : index
    %c0_23 = arith.constant 0 : index
    %23 = vector.load %arg10[%c0_22, %c0_23] : memref<32x2xf32, #tpu.memory_space<vmem>>, vector<32x2xf32>
    %cst_24 = arith.constant dense<0.000000e+00> : vector<8x2xf32>
    %24 = tpu.matmul %22, %23, %cst_24 {dimension_numbers = #tpu.dot_dimension_numbers<[1], [0], [0], [1], [0, 0, 1, 1], [], []>} : vector<8x32xf32>, vector<32x2xf32>, vector<8x2xf32> -> vector<8x2xf32>
    %c0_25 = arith.constant 0 : index
    %c0_26 = arith.constant 0 : index
    %25 = vector.load %arg11[%c0_25, %c0_26] : memref<1x2xf32, #tpu.memory_space<vmem>>, vector<1x2xf32>
    %26 = vector.broadcast %25 : vector<1x2xf32> to vector<8x2xf32>
    %27 = arith.addf %24, %26 : vector<8x2xf32>
    %c0_27 = arith.constant 0 : index
    %c0_28 = arith.constant 0 : index
    %28 = vector.load %arg12[%c0_27, %c0_28] : memref<8x2xf32, #tpu.memory_space<vmem>>, vector<8x2xf32>
    tpu.vector_store %arg12[%c0_27, %c0_28], %27 {strides = array<i32>} : memref<8x2xf32, #tpu.memory_space<vmem>>, vector<8x2xf32>,
    return
  }
  func.func @transform_0(%arg0: i32) -> (i32, i32) {
    %c0_i32 = arith.constant 0 : i32
    %c0_i32_0 = arith.constant 0 : i32
    return %arg0, %c0_i32 : i32, i32
  }
  func.func @transform_1(%arg0: i32) -> (i32, i32) {
    %c0_i32 = arith.constant 0 : i32
    %c0_i32_0 = arith.constant 0 : i32
    return %arg0, %c0_i32 : i32, i32
  }
  func.func @transform_2(%arg0: i32) -> (i32, i32) {
    %c0_i32 = arith.constant 0 : i32
    %c0_i32_0 = arith.constant 0 : i32
    return %arg0, %c0_i32 : i32, i32
  }
  func.func @transform_3(%arg0: i32) -> (i32, i32) {
    %c0_i32 = arith.constant 0 : i32
    %c0_i32_0 = arith.constant 0 : i32
    %c0_i32_1 = arith.constant 0 : i32
    return %c0_i32, %c0_i32_0 : i32, i32
  }
  func.func @transform_4(%arg0: i32) -> (i32, i32) {
    %c0_i32 = arith.constant 0 : i32
    %c0_i32_0 = arith.constant 0 : i32
    %c0_i32_1 = arith.constant 0 : i32
    return %c0_i32, %c0_i32_0 : i32, i32
  }
  func.func @transform_5(%arg0: i32) -> (i32, i32) {
    %c0_i32 = arith.constant 0 : i32
    %c0_i32_0 = arith.constant 0 : i32
    %c0_i32_1 = arith.constant 0 : i32
    return %c0_i32, %c0_i32_0 : i32, i32
  }
  func.func @transform_6(%arg0: i32) -> (i32, i32) {
    %c0_i32 = arith.constant 0 : i32
    %c0_i32_0 = arith.constant 0 : i32
    %c0_i32_1 = arith.constant 0 : i32
    return %c0_i32, %c0_i32_0 : i32, i32
  }
  func.func @transform_7(%arg0: i32) -> (i32, i32) {
    %c0_i32 = arith.constant 0 : i32
    %c0_i32_0 = arith.constant 0 : i32
    %c0_i32_1 = arith.constant 0 : i32
    return %c0_i32, %c0_i32_0 : i32, i32
  }
  func.func @transform_8(%arg0: i32) -> (i32, i32) {
    %c0_i32 = arith.constant 0 : i32
    %c0_i32_0 = arith.constant 0 : i32
    %c0_i32_1 = arith.constant 0 : i32
    return %c0_i32, %c0_i32_0 : i32, i32
  }
  func.func @transform_9(%arg0: i32) -> (i32, i32) {
    %c0_i32 = arith.constant 0 : i32
    %c0_i32_0 = arith.constant 0 : i32
    %c0_i32_1 = arith.constant 0 : i32
    return %c0_i32, %c0_i32_0 : i32, i32
  }
  func.func @transform_10(%arg0: i32) -> (i32, i32) {
    %c0_i32 = arith.constant 0 : i32
    %c0_i32_0 = arith.constant 0 : i32
    %c0_i32_1 = arith.constant 0 : i32
    return %c0_i32, %c0_i32_0 : i32, i32
  }
  func.func @transform_11(%arg0: i32) -> (i32, i32) {
    %c0_i32 = arith.constant 0 : i32
    %c0_i32_0 = arith.constant 0 : i32
    return %arg0, %c0_i32 : i32, i32
  }
}

</mosaic_0001>

<bundles_post_ra>
// kernel: tpu_custom_call.1
= control target key start
LH: loop header
LB: loop body
LE: loop exit
PB: predicated region body
PF: predicated region fallthrough
CT: control target
= control target key end

     0   :  { %vm47_vm0 = vcmask 1043456   ;;  %v544_v0 = vmov 0.0   ;;  %vm545_vm1 = vmmov 0   ;;  %vm43_vm2 = vcmask 31744   ;;  %s671_s4 = inlined_call_operand.vmem [shape: f32[4,32], index: 4, kind: input, shape index: {}]   ;;  %s672_s1 = inlined_call_operand.vmem [shape: f32[8,4], index: 1, kind: input, shape index: {}]   ;;  %s673_s3 = inlined_call_operand.vmem [shape: f32[16,32], index: 3, kind: input, shape index: {}]   ;;  %s674_s5 = inlined_call_operand.vmem [shape: f32[2,32], index: 5, kind: input, shape index: {}]   ;;  %s675_s2 = inlined_call_operand.vmem [shape: f32[8,2], index: 2, kind: input, shape index: {}]   ;;  %s676_s0 = inlined_call_operand.vmem [shape: f32[8,16], index: 0, kind: input, shape index: {}]   ;;  %s677_s7 = inlined_call_operand.vmem [shape: f32[32,32], index: 7, kind: input, shape index: {}]   ;;  %s678_s9 = inlined_call_operand.vmem [shape: f32[32,2], index: 9, kind: input, shape index: {}]   ;;  %s679_s6 = inlined_call_operand.vmem [shape: f32[1,32], index: 6, kind: input, shape index: {}]   ;;  %s680_s8 = inlined_call_operand.vmem [shape: f32[1,32], index: 8, kind: input, shape index: {}]   ;;  %s681_s10 = inlined_call_operand.vmem [shape: f32[1,2], index: 10, kind: input, shape index: {}]   ;;  %s682_s11 = inlined_call_operand.vmem [shape: f32[8,2], index: 11, kind: output, shape index: {}]  }
   0x1   :  { %487 = vmatprep.subr.mxu0 %v544_v0  ;;  %v42_v1 = vld [vmem:[%s671_s4] sm:$0xf]  ;;  %489 = vmatprep.mubr.msk.f32.mxu0 %vm545_vm1, %v544_v0  ;;  %vm201_vm3 = vcmask 1041408   ;;  %v546_v4 = vmov 0.0|0.0   ;;  %v40_v5 = vld [vmem:[%s673_s3 + $0x8] sm:$0xff]  ;;  %vm197_vm4 = vcmask 15360  }
   0x2   :  { %v41_v2 = vld [vmem:[%s672_s1] sm:$0xff]  ;;  %488 = vmatpush3.msk.msra.mxu0 %vm47_vm0, %v42_v1  ;;  %526 = vmatprep.subr.bf16.mxu1 %v546_v4  ;;  %vm121_vm5 = vcmask 130048   ;;  %v286_v11 = vld [vmem:[%s677_s7 + $0x8] sm:$0xff]  ;;  %v287_v13 = vld [vmem:[%s677_s7 + $0x10] sm:$0xff]  ;;  %vm296_vm6 = vcmask 261120  }
   0x3   :  { %v39_v3 = vld [vmem:[%s673_s3] sm:$0xff]  ;;  %490 = vmatmul.mubr.msk.f32.vlgmr.msra.gmra.mrb[0].mxu0 %vm43_vm2, %v41_v2  ;;  %499 = vmatprep.subr.mxu0 %v544_v0  ;;  %v288_v14 = vld [vmem:[%s677_s7 + $0x18] sm:$0xff]  ;;  %v372_v17 = vld [vmem:[%s678_s9 + $0x8] sm:$0xff] }
   0x4   :  { %v196_v6 = vld [vmem:[%s674_s5] sm:$0x3]  ;;  %v527_v7 = vpack.c.bf16 %v40_v5, %v39_v3  ;;  %496 = vmatprep.mubr.msk.f32.mxu1 %vm545_vm1, %v544_v0  ;;  %501 = vmatprep.mubr.msk.f32.mxu0 %vm545_vm1, %v544_v0  ;;  %v533_v15 = vpack.c.bf16 %v288_v14, %v287_v13  ;;  %v373_v30 = vld [vmem:[%s678_s9 + $0x10] sm:$0xff]  ;;  %v374_v31 = vld [vmem:[%s678_s9 + $0x18] sm:$0xff] }
   0x5   :  { %500 = vmatpush3.msk.msra.mxu0 %vm201_vm3, %v196_v6  ;;  %v195_v8 = vld [vmem:[%s675_s2] sm:$0xff]  ;;  %v539_v32 = vpack.c.bf16 %v374_v31, %v373_v30 }
   0x6   :  { %528 = vmatpush3.bf16.msra.mxu1 %v527_v7  ;;  %v38_v9 = vld [vmem:[%s676_s0] sm:$0xff]  ;;  %535 = vmatprep.subr.bf16.mxu0 %v546_v4 }
   0x7   :  { %529 = vmatprep.subr.bf16.mxu1 %v546_v4  ;;  %502 = vmatmul.mubr.msk.f32.vlgmr.msra.gmra.mrb[2].mxu0 %vm197_vm4, %v195_v8  ;;  %v285_v10 = vld [vmem:[%s677_s7] sm:$0xff] }
   0x8   :  { %523 = vmatprep.mubr.msk.f32.mxu0 %vm545_vm1, %v544_v0  ;;  %v530_v12 = vpack.c.bf16 %v286_v11, %v285_v10  ;;  %v371_v16 = vld [vmem:[%s678_s9] sm:$0xff] }
   0x9   :  { %497 = vmatmul.mubr.msk.f32.vlgmr.msra.gmra.mrb[0].mxu1 %vm121_vm5, %v38_v9  ;;  %v536_v18 = vpack.c.bf16 %v372_v17, %v371_v16  ;;  %v465_v26 = vld [vmem:[%s679_s6] ss:$0 sm:$0xff] }
   0xa   :  { %512 = vmatprep.mubr.msk.f32.mxu1 %vm545_vm1, %v544_v0  ;;  %531 = vmatpush3.bf16.msra.mxu1 %v530_v12  ;;  %v466_v33 = vld [vmem:[%s680_s8] ss:$0 sm:$0xff] }
   0xb   :  { %532 = vmatprep.subr.bf16.mxu1 %v546_v4  ;;  %537 = vmatpush3.bf16.msra.mxu0 %v536_v18  ;;  %v468_v38 = vld [vmem:[%s681_s10] ss:$0 sm:$0xff] }
   0xc   :  { %538 = vmatprep.subr.bf16.mxu0 %v546_v4 }
   0xe   :  { %534 = vmatpush3.bf16.msra.mxu1 %v533_v15 }
   0xf   :  { %540 = vmatpush3.bf16.msra.mxu0 %v539_v32 }
  0xd6   :  { %v117_v19 = vpop.f32.mrb[0].mxu0 }
  0xd7   :  { %v491_v20 = vpop.f32.mrb[1].mxu0 }
  0xda   :  { %v271_v21 = vpop.f32.mrb[2].mxu0 }
  0xdb   :  { %v503_v23 = vpop.f32.mrb[3].mxu0 }
  0xdc   :  { %v191_v22 = vpop.f32.mrb[0].mxu1 }
  0xdd   :  { %v192_v24 = vadd.f32 %v191_v22, %v117_v19  ;;  %v498_v25 = vpop.f32.mrb[1].mxu1 }
  0xdf   :  { %v275_v27 = vadd.f32 %v271_v21, %v192_v24 }
  0xe1   :  { %v283_v28 = vadd.f32 %v465_v26, %v275_v27 }
  0xe3   :  { %v284_v29 = vmax.f32 %v283_v28, 0.0 }
  0xe5   :  { %513 = vmatmul.mubr.msk.f32.vlgmr.msra.gmra.mrb[2].mxu1 %vm296_vm6, %v284_v29 }
 0x1b8   :  { %v366_v34 = vpop.f32.mrb[2].mxu1 }
 0x1b9   :  { %v367_v35 = vadd.f32 %v466_v33, %v366_v34  ;;  %v514_v36 = vpop.f32.mrb[3].mxu1 }
 0x1bb   :  { %v370_v37 = vmax.f32 %v367_v35, 0.0 }
 0x1bd   :  { %524 = vmatmul.mubr.msk.f32.vlgmr.msra.gmra.mrb[4].mxu0 %vm296_vm6, %v370_v37 }
 0x290   :  { %v451_v39 = vpop.f32.mrb[4].mxu0 }
 0x291   :  { %v452_v40 = vadd.f32 %v468_v38, %v451_v39  ;;  %v525_v41 = vpop.f32.mrb[5].mxu0 }
 0x293   :  { %455 = vst.msk [vmem:[%s682_s11] sm:$0xff] %vm197_vm4, %v452_v40 }

</bundles_post_ra>
